<compile_context>
chip_gen: v5e
topology: v5e:2x2
jax: 0.10.0
libtpu: 0.0.40
codegen_flags: <defaults>
</compile_context>

<pallas_src>
import functools

import jax
import jax.numpy as jnp
import numpy as np
from jax.experimental import pallas as pl
from jax.experimental.pallas import tpu as pltpu

LN_EPS = 1e-5
_NEG_BIG = -1e30          # "minus infinity" that stays finite under arithmetic
_HIGHEST = jax.lax.Precision.HIGHEST


# ---------------------------------------------------------------------------
# small helpers
# ---------------------------------------------------------------------------
def _round_up(v, m):
    return (v + m - 1) // m * m


def _cdiv(a, b):
    return -(-a // b)


def _padded_bytes(shape, dtype):
    """VMEM bytes of one buffer padded to its native tile (dtype-aware sublanes)."""
    dtype = np.dtype(dtype)
    sub = 8 * max(1, 4 // dtype.itemsize)        # f32 -> 8, bf16 -> 16, int8 -> 32
    shape = tuple(int(d) for d in shape)
    if len(shape) == 1:
        shape = (1,) + shape
    lead = 1
    for d in shape[:-2]:
        lead *= d
    return lead * _round_up(shape[-2], sub) * _round_up(shape[-1], 128) * dtype.itemsize


def _vmem_capacity_bytes():
    try:
        return int(pltpu.get_tpu_info().vmem_capacity_bytes)
    except Exception:
        return 64 * 1024 * 1024                  # conservative default (v7x per-TC)


def _vmem_limit_bytes(footprint, cap):
    lim = int(footprint * 1.5) + (8 << 20)
    lim = max(lim, 32 << 20)
    return int(min(lim, cap, 128 << 20))


def _const_spec(arr):
    zeros = (0,) * arr.ndim
    return pl.BlockSpec(arr.shape, lambda *_: zeros)


# ---------------------------------------------------------------------------
# in-kernel building blocks
# ---------------------------------------------------------------------------
def _logits_of(x, wcol):
    """conv_mask 1x1 conv -> (1, n) f32 logits.  VPU path for f32 I/O, bf16 MXU
    (f32 accumulation) otherwise.  The conv_mask bias is dropped: softmax over
    H*W is invariant to a constant shift."""
    if x.dtype == jnp.float32:
        return jnp.sum(x * wcol, axis=0, keepdims=True)
    return jax.lax.dot_general(wcol.astype(x.dtype), x, (((0,), (0,)), ((), ())),
                               preferred_element_type=jnp.float32)


def _bottlenecks(context, w1s_ref, pvec_ref, w2s_ref, b2s_ref):
    """context: (C, 1) f32.  Returns (add_term, sigmoid(mul_term)), each (C, 1)."""
    def branch(i):
        pv = pvec_ref[i]                                     # (P, 3) = [b1, gamma, beta]
        h = jnp.dot(w1s_ref[i], context,
                    preferred_element_type=jnp.float32) + pv[:, 0:1]        # (P, 1)
        mu = jnp.mean(h)
        var = jnp.mean((h - mu) * (h - mu))                  # biased (torch.LayerNorm)
        hn = (h - mu) * jax.lax.rsqrt(var + LN_EPS)
        hn = jnp.maximum(hn * pv[:, 1:2] + pv[:, 2:3], 0.0)                 # ReLU
        return jnp.dot(w2s_ref[i], hn,
                       preferred_element_type=jnp.float32) + b2s_ref[i]     # (C, 1)

    return branch(0), jax.nn.sigmoid(branch(1))              # add_term, sigmoid(mul)


# ---------------------------------------------------------------------------
# path 1: one full (C, HW) row per grid step (traffic-optimal single pass)
# ---------------------------------------------------------------------------
def _gc_kernel_full(x_ref, wcol_ref, w1s_ref, pvec_ref, w2s_ref, b2s_ref, o_ref):
    x = x_ref[...]                                           # (C, HW), io dtype
    logits = _logits_of(x, wcol_ref[...])                    # (1, HW) f32
    logits = logits - jnp.max(logits, axis=-1, keepdims=True)
    e = jnp.exp(logits)
    inv_l = pl.reciprocal(jnp.sum(e, axis=-1, keepdims=True), approx=False)
    # context = (x @ e^T) / sum(e): contraction over HW on the MXU; no
    # materialized (C, HW) f32 temporary and no full upcast of bf16 x.
    context = jax.lax.dot_general(
        x, e.astype(x.dtype), (((1,), (1,)), ((), ())),
        preferred_element_type=jnp.float32) * inv_l          # (C, 1) f32
    add_t, mul_t = _bottlenecks(context, w1s_ref, pvec_ref, w2s_ref, b2s_ref)
    o_ref[...] = (x * mul_t.astype(x.dtype) + add_t.astype(x.dtype)).astype(o_ref.dtype)


# ---------------------------------------------------------------------------
# path 2a: pool kernel -- online softmax attention pooling -> context (B, C, 1)
# ---------------------------------------------------------------------------
def _gc_pool_kernel(x_ref, wcol_ref, ctx_ref, m_ref, l_ref, cacc_ref,
                    *, n_tiles, hw_tile, hw_valid):
    s = pl.program_id(1)

    @pl.when(s == 0)
    def _init():
        m_ref[...] = jnp.full(m_ref.shape, _NEG_BIG, m_ref.dtype)
        l_ref[...] = jnp.zeros(l_ref.shape, l_ref.dtype)
        cacc_ref[...] = jnp.zeros(cacc_ref.shape, cacc_ref.dtype)

    x = x_ref[...]                                           # (C, hw_tile), io dtype
    if hw_valid % hw_tile != 0:                              # static: ragged spatial
        col = jax.lax.broadcasted_iota(jnp.int32, (1, hw_tile), 1) + s * hw_tile
        valid = col < hw_valid
        # Zero OOB columns of x (edge-block padding is undefined data) and push
        # their logits to -inf so they drop out of the softmax.
        x = jnp.where(valid, x, jnp.zeros_like(x))
        logits = jnp.where(valid, _logits_of(x, wcol_ref[...]), _NEG_BIG)
    else:
        logits = _logits_of(x, wcol_ref[...])                # (1, hw_tile) f32

    m_prev = m_ref[...]                                      # (1, 1)
    m_new = jnp.maximum(m_prev, jnp.max(logits, axis=-1, keepdims=True))
    alpha = jnp.exp(m_prev - m_new)
    e = jnp.exp(logits - m_new)                              # (1, hw_tile) f32
    l_ref[...] = alpha * l_ref[...] + jnp.sum(e, axis=-1, keepdims=True)
    cacc_ref[...] = alpha * cacc_ref[...] + jax.lax.dot_general(
        x, e.astype(x.dtype), (((1,), (1,)), ((), ())),
        preferred_element_type=jnp.float32)
    m_ref[...] = m_new

    @pl.when(s == n_tiles - 1)
    def _finalize():
        ctx_ref[...] = (cacc_ref[...]
                        * pl.reciprocal(l_ref[...], approx=False)).astype(ctx_ref.dtype)


# ---------------------------------------------------------------------------
# path 2b: bottleneck MLPs on the tiny (B, C, 1) context -- plain XLA
# ---------------------------------------------------------------------------
def _bottleneck_terms_xla(context, w1s, pvec, w2s, b2s):
    """context: (B, C, 1) f32 -> (add_term, sigmoid(mul_term)), each (B, C, 1)."""
    h = jnp.einsum('ipc,bco->bipo', w1s, context, precision=_HIGHEST)
    h = h + pvec[None, :, :, 0:1]                            # (B, 2, P, 1)
    mu = jnp.mean(h, axis=(2, 3), keepdims=True)
    var = jnp.mean((h - mu) ** 2, axis=(2, 3), keepdims=True)
    hn = (h - mu) * jax.lax.rsqrt(var + LN_EPS)
    hn = jnp.maximum(hn * pvec[None, :, :, 1:2] + pvec[None, :, :, 2:3], 0.0)
    out = jnp.einsum('icp,bipo->bico', w2s, hn, precision=_HIGHEST) + b2s[None]
    return out[:, 0], jax.nn.sigmoid(out[:, 1])              # (B, C, 1) each


# ---------------------------------------------------------------------------
# path 2c: fuse kernel -- out = x * sigmoid(mul) + add, lane-dense, param-free
# ---------------------------------------------------------------------------
def _gc_fuse_kernel(x_ref, add_ref, mul_ref, o_ref):
    x = x_ref[...]                                           # (C, tile), io dtype
    o_ref[...] = (x * mul_ref[...].astype(x.dtype)
                  + add_ref[...].astype(x.dtype)).astype(o_ref.dtype)


# ---------------------------------------------------------------------------
# wrapper: param packing, VMEM budgeting, path/tile selection
# ---------------------------------------------------------------------------
def pack_params(params, C):
    """Pack the module's 14 tensors into 5 arrays (fewer DMAs / BlockSpecs)."""
    f32 = jnp.float32
    wcol = params["w_mask"].reshape(C, 1).astype(f32)                     # (C, 1)
    w1s = jnp.stack([params["add_w1"], params["mul_w1"]]).astype(f32)     # (2, P, C)
    pvec = jnp.stack([
        jnp.concatenate([params["add_b1"], params["add_g"], params["add_beta"]], axis=1),
        jnp.concatenate([params["mul_b1"], params["mul_g"], params["mul_beta"]], axis=1),
    ]).astype(f32)                                                         # (2, P, 3)
    w2s = jnp.stack([params["add_w2"], params["mul_w2"]]).astype(f32)     # (2, C, P)
    b2s = jnp.stack([params["add_b2"], params["mul_b2"]]).astype(f32)     # (2, C, 1)
    # TODO(synk): optional bf16 packing of w1s/w2s would halve their VMEM on v7x.
    return [wcol, w1s, pvec, w2s, b2s]


def context_block_2d(x_nchw, params, *, io_dtype=None, mode="auto",
                     hw_tile=None, fuse_hw_tile=None, donate_x=False):
    """x_nchw: (B, C, H, W).  Returns same shape in io_dtype (default: x dtype).

    io_dtype=jnp.bfloat16 halves HBM traffic; pooling/context then run on the
    MXU in bf16 (f32 accumulation), so results differ from an f32 reference
    beyond simple output rounding.
    """
    B, C, H, W = (int(d) for d in x_nchw.shape)
    HW = H * W
    io_dtype = np.dtype(io_dtype) if io_dtype is not None else np.dtype(x_nchw.dtype)

    x = x_nchw.reshape(B, C, HW).astype(io_dtype)
    param_arrays = pack_params(params, C)
    wcol, w1s, pvec, w2s, b2s = param_arrays
    param_vmem = 2 * sum(_padded_bytes(a.shape, a.dtype) for a in param_arrays)

    cap = _vmem_capacity_bytes()
    budget = int(cap * 0.70)                    # headroom for compiler scratch
    f32 = np.dtype(np.float32)
    compute_dt = f32 if io_dtype == f32 else io_dtype
    small = _padded_bytes((C, 1), jnp.float32)

    def full_footprint():
        blk = _padded_bytes((C, HW), io_dtype)
        temps = _padded_bytes((C, HW), compute_dt) + 2 * _padded_bytes((8, HW), jnp.float32)
        return 4 * blk + temps + param_vmem     # 2x in + 2x out + temps + params

    def pool_footprint(t):
        blk = _padded_bytes((C, t), io_dtype)
        temps = _padded_bytes((C, t), compute_dt) + 2 * _padded_bytes((8, t), jnp.float32)
        fixed = 5 * small + 2 * _padded_bytes((8, 128), jnp.float32)
        return 2 * blk + temps + fixed          # 2x in + temps + wcol/ctx/scratch

    def fuse_footprint(t):
        blk = _padded_bytes((C, t), io_dtype)
        return 5 * blk + 4 * small              # 2x in + 2x out + temp + add/mul

    def pick_tile(footprint_fn, requested):
        hw_cap = max(128, _round_up(HW, 128))
        if requested is not None:
            return min(max(128, _round_up(int(requested), 128)), hw_cap)
        for t in (8192, 4096, 2048, 1024, 512, 256, 128):   # biggest that fits
            if t <= hw_cap and footprint_fn(t) <= budget:
                return t
        return 128

    if mode == "auto":
        mode = "full" if full_footprint() <= budget else "tiled"

    if mode == "full":
        out = pl.pallas_call(
            _gc_kernel_full,
            out_shape=jax.ShapeDtypeStruct((B, C, HW), io_dtype),
            grid_spec=pltpu.PrefetchScalarGridSpec(
                num_scalar_prefetch=0,
                grid=(B,),
                in_specs=([pl.BlockSpec((pl.Squeezed(), C, HW), lambda b: (b, 0, 0))]
                          + [_const_spec(a) for a in param_arrays]),
                out_specs=pl.BlockSpec((pl.Squeezed(), C, HW), lambda b: (b, 0, 0)),
                scratch_shapes=[]),
            compiler_params=pltpu.CompilerParams(
                dimension_semantics=("parallel",),
                vmem_limit_bytes=_vmem_limit_bytes(full_footprint(), cap)),
            input_output_aliases=({0: 0} if donate_x else {}),
        )(x, *param_arrays)
        return out.reshape(B, C, H, W)

    if mode != "tiled":
        raise ValueError(f"unknown mode: {mode!r}")

    # ---- pool: x -> context (B, C, 1) ---------------------------------------
    tp = pick_tile(pool_footprint, hw_tile)
    n_p = _cdiv(HW, tp)
    context = pl.pallas_call(
        functools.partial(_gc_pool_kernel, n_tiles=n_p, hw_tile=tp, hw_valid=HW),
        out_shape=jax.ShapeDtypeStruct((B, C, 1), jnp.float32),
        grid_spec=pltpu.PrefetchScalarGridSpec(
            num_scalar_prefetch=0,
            grid=(B, n_p),
            in_specs=[pl.BlockSpec((pl.Squeezed(), C, tp), lambda b, s: (b, 0, s)),
                      pl.BlockSpec((C, 1), lambda b, s: (0, 0))],
            out_specs=pl.BlockSpec((pl.Squeezed(), C, 1), lambda b, s: (b, 0, 0)),
            scratch_shapes=[pltpu.VMEM((1, 1), jnp.float32),     # running max
                            pltpu.VMEM((1, 1), jnp.float32),     # running sum-exp
                            pltpu.VMEM((C, 1), jnp.float32)]),   # running sum exp*x
        compiler_params=pltpu.CompilerParams(
            dimension_semantics=("parallel", "arbitrary"),
            vmem_limit_bytes=_vmem_limit_bytes(pool_footprint(tp), cap)),
    )(x, wcol)

    # ---- bottlenecks on (B, C, 1): tiny -> plain XLA ------------------------
    add_t, mul_t = _bottleneck_terms_xla(context, w1s, pvec, w2s, b2s)

    # ---- fuse: out = x * sigmoid(mul) + add ----------------------------------
    # TODO(synk): for B == 1 the pool sweep still runs on one TensorCore; a
    # C-split with a cross-block logits combine would be needed to use core 1.
    tf = pick_tile(fuse_footprint, fuse_hw_tile)
    n_f = _cdiv(HW, tf)
    out = pl.pallas_call(
        _gc_fuse_kernel,
        out_shape=jax.ShapeDtypeStruct((B, C, HW), io_dtype),
        grid_spec=pltpu.PrefetchScalarGridSpec(
            num_scalar_prefetch=0,
            grid=(B, n_f),
            in_specs=[pl.BlockSpec((pl.Squeezed(), C, tf), lambda b, s: (b, 0, s)),
                      pl.BlockSpec((pl.Squeezed(), C, 1), lambda b, s: (b, 0, 0)),
                      pl.BlockSpec((pl.Squeezed(), C, 1), lambda b, s: (b, 0, 0))],
            out_specs=pl.BlockSpec((pl.Squeezed(), C, tf), lambda b, s: (b, 0, s)),
            scratch_shapes=[]),
        compiler_params=pltpu.CompilerParams(
            dimension_semantics=("parallel", "parallel"),
            vmem_limit_bytes=_vmem_limit_bytes(fuse_footprint(tf), cap)),
        input_output_aliases=({0: 0} if donate_x else {}),
    )(x, add_t, mul_t)
    return out.reshape(B, C, H, W)


# ---------------------------------------------------------------------------
# parameter init + pure-JAX reference (mirrors the PyTorch forward)
# ---------------------------------------------------------------------------
def make_params(key, C, P):
    ks = jax.random.split(key, 8)
    scale = 0.1
    return {
        # conv_mask: Conv2d(C, 1, k=1) -> weight (1,C,1,1), bias (1,)
        "w_mask":  scale * jax.random.normal(ks[0], (1, C), jnp.float32),
        "b_mask":  scale * jax.random.normal(ks[1], (1, 1), jnp.float32),
        # channel_add_conv: Conv2d(C,P,1), LayerNorm([P,1,1]), ReLU, Conv2d(P,C,1)
        "add_w1":   scale * jax.random.normal(ks[2], (P, C), jnp.float32),
        "add_b1":   scale * jax.random.normal(ks[3], (P, 1), jnp.float32),
        "add_g":    jnp.ones((P, 1), jnp.float32),
        "add_beta": jnp.zeros((P, 1), jnp.float32),
        "add_w2":   scale * jax.random.normal(ks[4], (C, P), jnp.float32),
        "add_b2":   scale * jax.random.normal(ks[5], (C, 1), jnp.float32),
        # channel_mul_conv: same structure
        "mul_w1":   scale * jax.random.normal(ks[6], (P, C), jnp.float32),
        "mul_b1":   scale * jax.random.normal(ks[7], (P, 1), jnp.float32),
        "mul_g":    jnp.ones((P, 1), jnp.float32),
        "mul_beta": jnp.zeros((P, 1), jnp.float32),
        "mul_w2":   scale * jax.random.normal(jax.random.fold_in(key, 100), (C, P), jnp.float32),
        "mul_b2":   scale * jax.random.normal(jax.random.fold_in(key, 101), (C, 1), jnp.float32),
    }


def reference(x_nchw, params):
    B, C, H, W = x_nchw.shape
    x = x_nchw.reshape(B, C, H * W)
    logits = jnp.einsum('oc,bcl->bol', params["w_mask"], x,
                        precision=_HIGHEST) + params["b_mask"][0, 0]
    p = jax.nn.softmax(logits, axis=-1)                       # (B,1,HW)
    context = jnp.einsum('bcl,bol->bc', x, p, precision=_HIGHEST)[..., None]

    def bottleneck(ctx, w1, b1, g, beta, w2, b2):
        h = jnp.einsum('pc,bcx->bpx', w1, ctx, precision=_HIGHEST) + b1
        mu = jnp.mean(h, axis=(1, 2), keepdims=True)
        var = jnp.mean((h - mu) ** 2, axis=(1, 2), keepdims=True)
        hn = (h - mu) / jnp.sqrt(var + LN_EPS) * g + beta
        hn = jnp.maximum(hn, 0.0)
        return jnp.einsum('cp,bpx->bcx', w2, hn, precision=_HIGHEST) + b2

    mul_t = jax.nn.sigmoid(bottleneck(context, params["mul_w1"], params["mul_b1"],
                                      params["mul_g"], params["mul_beta"],
                                      params["mul_w2"], params["mul_b2"]))
    add_t = bottleneck(context, params["add_w1"], params["add_b1"],
                       params["add_g"], params["add_beta"],
                       params["add_w2"], params["add_b2"])
    return (x * mul_t + add_t).reshape(B, C, H, W)


if __name__ == "__main__":
    B, C, H, W = 2, 4, 16, 16
    P = 8  # bottleneck planes

    key = jax.random.PRNGKey(0)
    kx, kp = jax.random.split(key)
    x = jax.random.normal(kx, (B, C, H, W), jnp.float32)
    params = make_params(kp, C, P)
    ref = reference(x, params)

    tol = dict(rtol=1e-4, atol=1e-4)

    # 1) single-pass (full-row) path, f32 I/O
    out_full = jax.block_until_ready(context_block_2d(x, params, mode="full"))
    np.testing.assert_allclose(np.asarray(out_full), np.asarray(ref), **tol)

    # 2) tiled pool+fuse path (forced); HW divides both tiles exactly
    out_tiled = jax.block_until_ready(
        context_block_2d(x, params, mode="tiled", hw_tile=128, fuse_hw_tile=128))
    np.testing.assert_allclose(np.asarray(out_tiled), np.asarray(ref), **tol)

    # 3) tiled path with a ragged spatial size (cdiv grid + in-kernel masking,
    #    masked edge-block writeback; no XLA pad/slice passes)
    H2 = W2 = 15
    x2 = jax.random.normal(jax.random.fold_in(key, 7), (B, C, H2, W2), jnp.float32)
    ref2 = reference(x2, params)
    out2 = jax.block_until_ready(
        context_block_2d(x2, params, mode="tiled", hw_tile=128, fuse_hw_tile=128))
    np.testing.assert_allclose(np.asarray(out2), np.asarray(ref2), **tol)

    # 4) bf16 HBM I/O (bf16 MXU pooling, no f32 upcast temp); loose compare
    out_bf16 = jax.block_until_ready(
        context_block_2d(x, params, mode="full", io_dtype=jnp.bfloat16))
    np.testing.assert_allclose(np.asarray(out_bf16.astype(jnp.float32)),
                               np.asarray(ref), rtol=5e-2, atol=5e-2)

    # 5) auto mode (VMEM-budgeted path selection)
    out_auto = jax.block_until_ready(context_block_2d(x, params))
    np.testing.assert_allclose(np.asarray(out_auto), np.asarray(ref), **tol)

    print("KERNEL_OK")
</pallas_src>

<mosaic_0001>
module attributes {stable_mosaic.version = 11 : i64} {
  func.func @_gc_kernel_full(%arg0: i32, %arg1: memref<1x4x256xf32, #tpu.memory_space<vmem>>, %arg2: memref<4x1xf32, #tpu.memory_space<vmem>>, %arg3: memref<2x8x4xf32, #tpu.memory_space<vmem>>, %arg4: memref<2x8x3xf32, #tpu.memory_space<vmem>>, %arg5: memref<2x4x8xf32, #tpu.memory_space<vmem>>, %arg6: memref<2x4x1xf32, #tpu.memory_space<vmem>>, %arg7: memref<1x4x256xf32, #tpu.memory_space<vmem>>) attributes {dimension_semantics = [#tpu.dimension_semantics<parallel>], iteration_bounds = array<i64: 2>, scalar_prefetch = 0 : i64, scratch_operands = 0 : i64, tpu.core_type = #tpu.core_type<tc>, window_params = [{transform_indices = @transform_0, window_bounds = array<i64: 1, 4, 256>}, {pipeline_mode = #tpu.pipeline_mode<synchronous>, transform_indices = @transform_1, window_bounds = array<i64: 4, 1>}, {pipeline_mode = #tpu.pipeline_mode<synchronous>, transform_indices = @transform_2, window_bounds = array<i64: 2, 8, 4>}, {pipeline_mode = #tpu.pipeline_mode<synchronous>, transform_indices = @transform_3, window_bounds = array<i64: 2, 8, 3>}, {pipeline_mode = #tpu.pipeline_mode<synchronous>, transform_indices = @transform_4, window_bounds = array<i64: 2, 4, 8>}, {pipeline_mode = #tpu.pipeline_mode<synchronous>, transform_indices = @transform_5, window_bounds = array<i64: 2, 4, 1>}, {transform_indices = @transform_6, window_bounds = array<i64: 1, 4, 256>}]} {
    %c0 = arith.constant 0 : index
    %c0_0 = arith.constant 0 : index
    %c0_1 = arith.constant 0 : index
    %0 = vector.load %arg1[%c0, %c0_0, %c0_1] : memref<1x4x256xf32, #tpu.memory_space<vmem>>, vector<1x4x256xf32>
    %1 = vector.shape_cast %0 : vector<1x4x256xf32> to vector<4x256xf32>
    %c0_2 = arith.constant 0 : index
    %c0_3 = arith.constant 0 : index
    %2 = vector.load %arg2[%c0_2, %c0_3] : memref<4x1xf32, #tpu.memory_space<vmem>>, vector<4x1xf32>
    %3 = vector.broadcast %2 : vector<4x1xf32> to vector<4x256xf32>
    %4 = arith.mulf %1, %3 : vector<4x256xf32>
    %cst = arith.constant dense<0.000000e+00> : vector<256xf32>
    %5 = vector.multi_reduction <add>, %4, %cst [0] : vector<4x256xf32> to vector<256xf32>
    %6 = vector.shape_cast %5 : vector<256xf32> to vector<1x256xf32>
    %cst_4 = arith.constant dense<0xFF800000> : vector<1xf32>
    %7 = vector.multi_reduction <maximumf>, %6, %cst_4 [1] : vector<1x256xf32> to vector<1xf32>
    %8 = vector.shape_cast %7 : vector<1xf32> to vector<1x1xf32>
    %9 = vector.broadcast %8 : vector<1x1xf32> to vector<1x256xf32>
    %10 = arith.subf %6, %9 : vector<1x256xf32>
    %11 = math.exp %10 : vector<1x256xf32>
    %cst_5 = arith.constant dense<0.000000e+00> : vector<1xf32>
    %12 = vector.multi_reduction <add>, %11, %cst_5 [1] : vector<1x256xf32> to vector<1xf32>
    %13 = vector.shape_cast %12 : vector<1xf32> to vector<1x1xf32>
    %14 = tpu.reciprocal %13 : vector<1x1xf32> -> vector<1x1xf32>
    %cst_6 = arith.constant dense<0.000000e+00> : vector<4x1xf32>
    %15 = tpu.matmul %1, %11, %cst_6 {dimension_numbers = #tpu.dot_dimension_numbers<[1], [1], [0], [0], [0, 0, 1, 0], [], []>} : vector<4x256xf32>, vector<1x256xf32>, vector<4x1xf32> -> vector<4x1xf32>
    %16 = vector.broadcast %14 : vector<1x1xf32> to vector<4x1xf32>
    %17 = arith.mulf %15, %16 : vector<4x1xf32>
    %c0_7 = arith.constant 0 : index
    %c0_8 = arith.constant 0 : index
    %c0_9 = arith.constant 0 : index
    %18 = vector.load %arg4[%c0_7, %c0_8, %c0_9] : memref<2x8x3xf32, #tpu.memory_space<vmem>>, vector<1x8x3xf32>
    %19 = vector.shape_cast %18 : vector<1x8x3xf32> to vector<8x3xf32>
    %c0_10 = arith.constant 0 : index
    %c0_11 = arith.constant 0 : index
    %c0_12 = arith.constant 0 : index
    %20 = vector.load %arg3[%c0_10, %c0_11, %c0_12] : memref<2x8x4xf32, #tpu.memory_space<vmem>>, vector<1x8x4xf32>
    %21 = vector.shape_cast %20 : vector<1x8x4xf32> to vector<8x4xf32>
    %cst_13 = arith.constant dense<0.000000e+00> : vector<8x1xf32>
    %22 = tpu.matmul %21, %17, %cst_13 {dimension_numbers = #tpu.dot_dimension_numbers<[1], [0], [0], [1], [0, 0, 1, 1], [], []>} : vector<8x4xf32>, vector<4x1xf32>, vector<8x1xf32> -> vector<8x1xf32>
    %23 = vector.extract_strided_slice %19 {offsets = [0, 0], sizes = [8, 1], strides = [1, 1]} : vector<8x3xf32> to vector<8x1xf32>
    %24 = arith.addf %22, %23 : vector<8x1xf32>
    %25 = vector.shape_cast %24 : vector<8x1xf32> to vector<1x8x1xf32>
    %cst_14 = arith.constant dense<0.000000e+00> : vector<1xf32>
    %26 = vector.multi_reduction <add>, %25, %cst_14 [1, 2] : vector<1x8x1xf32> to vector<1xf32>
    %27 = vector.shape_cast %26 : vector<1xf32> to vector<1x1x1xf32>
    %28 = vector.extract %27[0, 0, 0] : f32 from vector<1x1x1xf32>
    %cst_15 = arith.constant 8.000000e+00 : f32
    %29 = arith.divf %28, %cst_15 : f32
    %30 = vector.broadcast %29 : f32 to vector<8x1xf32>
    %31 = arith.subf %24, %30 : vector<8x1xf32>
    %32 = vector.broadcast %29 : f32 to vector<8x1xf32>
    %33 = arith.subf %24, %32 : vector<8x1xf32>
    %34 = arith.mulf %31, %33 : vector<8x1xf32>
    %35 = vector.shape_cast %34 : vector<8x1xf32> to vector<1x8x1xf32>
    %cst_16 = arith.constant dense<0.000000e+00> : vector<1xf32>
    %36 = vector.multi_reduction <add>, %35, %cst_16 [1, 2] : vector<1x8x1xf32> to vector<1xf32>
    %37 = vector.shape_cast %36 : vector<1xf32> to vector<1x1x1xf32>
    %38 = vector.extract %37[0, 0, 0] : f32 from vector<1x1x1xf32>
    %cst_17 = arith.constant 8.000000e+00 : f32
    %39 = arith.divf %38, %cst_17 : f32
    %40 = vector.broadcast %29 : f32 to vector<8x1xf32>
    %41 = arith.subf %24, %40 : vector<8x1xf32>
    %cst_18 = arith.constant 9.99999974E-6 : f32
    %42 = arith.addf %39, %cst_18 : f32
    %43 = math.rsqrt %42 : f32
    %44 = vector.broadcast %43 : f32 to vector<8x1xf32>
    %45 = arith.mulf %41, %44 : vector<8x1xf32>
    %46 = vector.extract_strided_slice %19 {offsets = [0, 1], sizes = [8, 1], strides = [1, 1]} : vector<8x3xf32> to vector<8x1xf32>
    %47 = arith.mulf %45, %46 : vector<8x1xf32>
    %48 = vector.extract_strided_slice %19 {offsets = [0, 2], sizes = [8, 1], strides = [1, 1]} : vector<8x3xf32> to vector<8x1xf32>
    %49 = arith.addf %47, %48 : vector<8x1xf32>
    %cst_19 = arith.constant 0.000000e+00 : f32
    %50 = vector.broadcast %cst_19 : f32 to vector<8x1xf32>
    %51 = arith.maximumf %49, %50 : vector<8x1xf32>
    %c0_20 = arith.constant 0 : index
    %c0_21 = arith.constant 0 : index
    %c0_22 = arith.constant 0 : index
    %52 = vector.load %arg5[%c0_20, %c0_21, %c0_22] : memref<2x4x8xf32, #tpu.memory_space<vmem>>, vector<1x4x8xf32>
    %53 = vector.shape_cast %52 : vector<1x4x8xf32> to vector<4x8xf32>
    %cst_23 = arith.constant dense<0.000000e+00> : vector<4x1xf32>
    %54 = tpu.matmul %53, %51, %cst_23 {dimension_numbers = #tpu.dot_dimension_numbers<[1], [0], [0], [1], [0, 0, 1, 1], [], []>} : vector<4x8xf32>, vector<8x1xf32>, vector<4x1xf32> -> vector<4x1xf32>
    %c0_24 = arith.constant 0 : index
    %c0_25 = arith.constant 0 : index
    %c0_26 = arith.constant 0 : index
    %55 = vector.load %arg6[%c0_24, %c0_25, %c0_26] : memref<2x4x1xf32, #tpu.memory_space<vmem>>, vector<1x4x1xf32>
    %56 = vector.shape_cast %55 : vector<1x4x1xf32> to vector<4x1xf32>
    %57 = arith.addf %54, %56 : vector<4x1xf32>
    %c1 = arith.constant 1 : index
    %c0_27 = arith.constant 0 : index
    %c0_28 = arith.constant 0 : index
    %58 = vector.load %arg4[%c1, %c0_27, %c0_28] : memref<2x8x3xf32, #tpu.memory_space<vmem>>, vector<1x8x3xf32>
    %59 = vector.shape_cast %58 : vector<1x8x3xf32> to vector<8x3xf32>
    %c1_29 = arith.constant 1 : index
    %c0_30 = arith.constant 0 : index
    %c0_31 = arith.constant 0 : index
    %60 = vector.load %arg3[%c1_29, %c0_30, %c0_31] : memref<2x8x4xf32, #tpu.memory_space<vmem>>, vector<1x8x4xf32>
    %61 = vector.shape_cast %60 : vector<1x8x4xf32> to vector<8x4xf32>
    %cst_32 = arith.constant dense<0.000000e+00> : vector<8x1xf32>
    %62 = tpu.matmul %61, %17, %cst_32 {dimension_numbers = #tpu.dot_dimension_numbers<[1], [0], [0], [1], [0, 0, 1, 1], [], []>} : vector<8x4xf32>, vector<4x1xf32>, vector<8x1xf32> -> vector<8x1xf32>
    %63 = vector.extract_strided_slice %59 {offsets = [0, 0], sizes = [8, 1], strides = [1, 1]} : vector<8x3xf32> to vector<8x1xf32>
    %64 = arith.addf %62, %63 : vector<8x1xf32>
    %65 = vector.shape_cast %64 : vector<8x1xf32> to vector<1x8x1xf32>
    %cst_33 = arith.constant dense<0.000000e+00> : vector<1xf32>
    %66 = vector.multi_reduction <add>, %65, %cst_33 [1, 2] : vector<1x8x1xf32> to vector<1xf32>
    %67 = vector.shape_cast %66 : vector<1xf32> to vector<1x1x1xf32>
    %68 = vector.extract %67[0, 0, 0] : f32 from vector<1x1x1xf32>
    %cst_34 = arith.constant 8.000000e+00 : f32
    %69 = arith.divf %68, %cst_34 : f32
    %70 = vector.broadcast %69 : f32 to vector<8x1xf32>
    %71 = arith.subf %64, %70 : vector<8x1xf32>
    %72 = vector.broadcast %69 : f32 to vector<8x1xf32>
    %73 = arith.subf %64, %72 : vector<8x1xf32>
    %74 = arith.mulf %71, %73 : vector<8x1xf32>
    %75 = vector.shape_cast %74 : vector<8x1xf32> to vector<1x8x1xf32>
    %cst_35 = arith.constant dense<0.000000e+00> : vector<1xf32>
    %76 = vector.multi_reduction <add>, %75, %cst_35 [1, 2] : vector<1x8x1xf32> to vector<1xf32>
    %77 = vector.shape_cast %76 : vector<1xf32> to vector<1x1x1xf32>
    %78 = vector.extract %77[0, 0, 0] : f32 from vector<1x1x1xf32>
    %cst_36 = arith.constant 8.000000e+00 : f32
    %79 = arith.divf %78, %cst_36 : f32
    %80 = vector.broadcast %69 : f32 to vector<8x1xf32>
    %81 = arith.subf %64, %80 : vector<8x1xf32>
    %cst_37 = arith.constant 9.99999974E-6 : f32
    %82 = arith.addf %79, %cst_37 : f32
    %83 = math.rsqrt %82 : f32
    %84 = vector.broadcast %83 : f32 to vector<8x1xf32>
    %85 = arith.mulf %81, %84 : vector<8x1xf32>
    %86 = vector.extract_strided_slice %59 {offsets = [0, 1], sizes = [8, 1], strides = [1, 1]} : vector<8x3xf32> to vector<8x1xf32>
    %87 = arith.mulf %85, %86 : vector<8x1xf32>
    %88 = vector.extract_strided_slice %59 {offsets = [0, 2], sizes = [8, 1], strides = [1, 1]} : vector<8x3xf32> to vector<8x1xf32>
    %89 = arith.addf %87, %88 : vector<8x1xf32>
    %cst_38 = arith.constant 0.000000e+00 : f32
    %90 = vector.broadcast %cst_38 : f32 to vector<8x1xf32>
    %91 = arith.maximumf %89, %90 : vector<8x1xf32>
    %c1_39 = arith.constant 1 : index
    %c0_40 = arith.constant 0 : index
    %c0_41 = arith.constant 0 : index
    %92 = vector.load %arg5[%c1_39, %c0_40, %c0_41] : memref<2x4x8xf32, #tpu.memory_space<vmem>>, vector<1x4x8xf32>
    %93 = vector.shape_cast %92 : vector<1x4x8xf32> to vector<4x8xf32>
    %cst_42 = arith.constant dense<0.000000e+00> : vector<4x1xf32>
    %94 = tpu.matmul %93, %91, %cst_42 {dimension_numbers = #tpu.dot_dimension_numbers<[1], [0], [0], [1], [0, 0, 1, 1], [], []>} : vector<4x8xf32>, vector<8x1xf32>, vector<4x1xf32> -> vector<4x1xf32>
    %c1_43 = arith.constant 1 : index
    %c0_44 = arith.constant 0 : index
    %c0_45 = arith.constant 0 : index
    %95 = vector.load %arg6[%c1_43, %c0_44, %c0_45] : memref<2x4x1xf32, #tpu.memory_space<vmem>>, vector<1x4x1xf32>
    %96 = vector.shape_cast %95 : vector<1x4x1xf32> to vector<4x1xf32>
    %97 = arith.addf %94, %96 : vector<4x1xf32>
    %98 = arith.negf %97 : vector<4x1xf32>
    %99 = math.exp %98 : vector<4x1xf32>
    %cst_46 = arith.constant 1.000000e+00 : f32
    %100 = vector.broadcast %cst_46 : f32 to vector<4x1xf32>
    %101 = arith.addf %100, %99 : vector<4x1xf32>
    %102 = arith.divf %100, %101 : vector<4x1xf32>
    %103 = vector.broadcast %102 : vector<4x1xf32> to vector<4x256xf32>
    %104 = arith.mulf %1, %103 : vector<4x256xf32>
    %105 = vector.broadcast %57 : vector<4x1xf32> to vector<4x256xf32>
    %106 = arith.addf %104, %105 : vector<4x256xf32>
    %c0_47 = arith.constant 0 : index
    %c0_48 = arith.constant 0 : index
    %c0_49 = arith.constant 0 : index
    %107 = vector.load %arg7[%c0_47, %c0_48, %c0_49] : memref<1x4x256xf32, #tpu.memory_space<vmem>>, vector<1x4x256xf32>
    %108 = vector.shape_cast %107 : vector<1x4x256xf32> to vector<4x256xf32>
    %109 = vector.shape_cast %106 : vector<4x256xf32> to vector<1x4x256xf32>
    tpu.vector_store %arg7[%c0_47, %c0_48, %c0_49], %109 {strides = array<i32>} : memref<1x4x256xf32, #tpu.memory_space<vmem>>, vector<1x4x256xf32>,
    return
  }
  func.func @transform_0(%arg0: i32) -> (i32, i32, i32) {
    %c0_i32 = arith.constant 0 : i32
    %c0_i32_0 = arith.constant 0 : i32
    %c0_i32_1 = arith.constant 0 : i32
    return %arg0, %c0_i32, %c0_i32_0 : i32, i32, i32
  }
  func.func @transform_1(%arg0: i32) -> (i32, i32) {
    %c0_i32 = arith.constant 0 : i32
    %c0_i32_0 = arith.constant 0 : i32
    %c0_i32_1 = arith.constant 0 : i32
    return %c0_i32, %c0_i32_0 : i32, i32
  }
  func.func @transform_2(%arg0: i32) -> (i32, i32, i32) {
    %c0_i32 = arith.constant 0 : i32
    %c0_i32_0 = arith.constant 0 : i32
    %c0_i32_1 = arith.constant 0 : i32
    %c0_i32_2 = arith.constant 0 : i32
    return %c0_i32, %c0_i32_0, %c0_i32_1 : i32, i32, i32
  }
  func.func @transform_3(%arg0: i32) -> (i32, i32, i32) {
    %c0_i32 = arith.constant 0 : i32
    %c0_i32_0 = arith.constant 0 : i32
    %c0_i32_1 = arith.constant 0 : i32
    %c0_i32_2 = arith.constant 0 : i32
    return %c0_i32, %c0_i32_0, %c0_i32_1 : i32, i32, i32
  }
  func.func @transform_4(%arg0: i32) -> (i32, i32, i32) {
    %c0_i32 = arith.constant 0 : i32
    %c0_i32_0 = arith.constant 0 : i32
    %c0_i32_1 = arith.constant 0 : i32
    %c0_i32_2 = arith.constant 0 : i32
    return %c0_i32, %c0_i32_0, %c0_i32_1 : i32, i32, i32
  }
  func.func @transform_5(%arg0: i32) -> (i32, i32, i32) {
    %c0_i32 = arith.constant 0 : i32
    %c0_i32_0 = arith.constant 0 : i32
    %c0_i32_1 = arith.constant 0 : i32
    %c0_i32_2 = arith.constant 0 : i32
    return %c0_i32, %c0_i32_0, %c0_i32_1 : i32, i32, i32
  }
  func.func @transform_6(%arg0: i32) -> (i32, i32, i32) {
    %c0_i32 = arith.constant 0 : i32
    %c0_i32_0 = arith.constant 0 : i32
    %c0_i32_1 = arith.constant 0 : i32
    return %arg0, %c0_i32, %c0_i32_0 : i32, i32, i32
  }
}

</mosaic_0001>

<bundles_post_ra>
// kernel: tpu_custom_call.1
= control target key start
LH: loop header
LB: loop body
LE: loop exit
PB: predicated region body
PF: predicated region fallthrough
CT: control target
= control target key end

     0   :  { %11 = vsyncpa [#allocation3], 0  ;;  %s1043_s0 = inlined_call_operand.vmem [shape: f32[2,4,256], index: 0, kind: input, shape index: {}]   ;;  %s1044_s1 = inlined_call_operand.vmem [shape: f32[4,1], index: 1, kind: input, shape index: {}]   ;;  %s1045_s2 = inlined_call_operand.vmem [shape: f32[2,8,4], index: 2, kind: input, shape index: {}]   ;;  %s1046_s3 = inlined_call_operand.vmem [shape: f32[2,8,3], index: 3, kind: input, shape index: {}]   ;;  %s1047_s4 = inlined_call_operand.vmem [shape: f32[2,4,8], index: 4, kind: input, shape index: {}]   ;;  %s1048_s5 = inlined_call_operand.vmem [shape: f32[2,4,1], index: 5, kind: input, shape index: {}]   ;;  %s1049_s6 = inlined_call_operand.hbm [shape: f32[2,4,256], index: 6, kind: output, shape index: {}]  }
   0x1   :  { %13 = vsyncpa [#allocation3 + $0x1], 0  ;;  %s890_s21 = smov 0   ;;  %s892_s22 = smov 0  }
   0x2   :  { %s894_s23 = smov 0   ;;  %s896_s24 = smov 0  }
   0x3 LB: > { %s911_s25 = sadd.s32 4294967295, %s848_s24   ;;  %s685_s26 = sadd.s32 4294967294, %s848_s24   ;;  %s848_s24 = sphi %s896_s24, %s1055_s24   ;;  %s844_s23 = sphi %s894_s23, %s1054_s23   ;;  %s840_s22 = sphi %s892_s22, %s1053_s22   ;;  %s836_s21 = sphi %s890_s21, %s1052_s21  }
   0x4   : > { %s915_s27 = sadd.s32 1, %s848_s24   ;;  %s157_s28 = sadd.s32 1, %s844_s23 }
   0x5   : > { %s154_s29 = ssub.s32 %s848_s24, %s915_s27  ;;  %p167_p0 = scmp.ne.s32.totalorder %s844_s23, %s840_s22 }
   0x6   : > { %p155_p1 = scmp.eq.s32.totalorder %s154_s29, 0  ;;  %p168_p2 = scmp.eq.s32.totalorder %s911_s25, 1 }
   0x7   : > { %p173_p3 = scmp.ne.s32.totalorder %s840_s22, %s836_s21  ;;  %p174_p4 = scmp.eq.s32.totalorder %s685_s26, 1 }
   0x8   : > { %s926_s30 = scalar_select %p155_p1, %s844_s23, %s157_s28  }
   0x9   : > { %p928_p5 = por %p168_p2, %p167_p0  ;;  %p932_p6 = por %p174_p4, %p173_p3 }
   0xa   : > { %p688_p7 = scmp.ge.s32.totalorder %s848_s24, 1  ;;  %p215_p8 = scmp.lt.s32.totalorder %s848_s24, 3 }
   0xc   : > { %p216_p9 = pnand %p688_p7, %p215_p8 }
   0xd   : > { %p245_p10 = scmp.lt.s32.totalorder (!%p216_p9), %s911_s25, 1  ;;  %s854_s13 = smov (!%p216_p9), 126  }
   0xe   : > { %219 = sbr.rel (%p216_p9) target bundleno = 1552 (0x610), region = 44 }
  0x13   : > { %v251_v0 = vld [vmem:[%s1044_s1] sm:$0xf]  ;;  %v850_v1 = vmov 0   ;;  %s246_s11 = scalar_select %p245_p10, %s911_s25, 1  ;;  %v851_v2 = vmov 839922192  }
  0x14   : > { %768 = vset.pattern.permute.xlu0 %v850_v1  ;;  %769 = vset.pattern.permute.xlu2 %v850_v1  ;;  %v257_v3 = vunpack.c.l.s4 %v851_v2  ;;  %vm268_vm0 = vcmask 1043456   ;;  %v328_v55 = vld [vmem:[%s1045_s2] sm:$0xff]  ;;  %vm329_vm5 = vcmask 31744   ;;  %vm356_vm6 = vcmask 7168   ;;  %v696_v60 = vld [vmem:[%s1045_s2 + $0x8] sm:$0xff] }
  0x15   : > { %254 = vperm.xlu0 %768, %v251_v0   ;;  %s708_s12 = sshll.u32 %s246_s11, 3  ;;  %v966_v56 = vld [vmem:[%s1046_s3] sm:$0xff]  ;;  %v852_v61 = vmov 8.0   ;;  %vm425_vm14 = vcmask 64512  }
  0x16   : > { %v943_v4 = vunpack.c.0.s8 %v257_v3  ;;  %s249_s15 = scalar_lea.vmem %s1043_s0, %s708_s12  ;;  %s853_s12 = smov 127  }
  0x17   : > { %v948_v6 = vld [vmem:[%s249_s15] sm:$0xff] }
  0x87   : > { %v255_v5 = vpop.permute.xlu0 %254 }
  0x88   : > { %v259_v7 = vperm.slane %v255_v5, %v943_v4 }
  0x8a   : > { %v261_v8 = vmul.f32 %v259_v7, %v948_v6 }
  0x8c   : > { %263 = vst [vmem:[#allocation1] ss:$2 sm:$0xff] %v261_v8 }
  0x93   : > { %v264_v9 = vld.sshfl [vmem:[#allocation1] sm:$0xff pattern:$0x75316420]  ;;  %v265_v10 = vld.sshfl [vmem:[#allocation1 + $0x8] sm:$0xff pattern:$0x75316420] }
  0x94   : > { %v269_v11 = vsel %vm268_vm0, %v264_v9, 0.0  ;;  %v276_v12 = vsel %vm268_vm0, %v265_v10, 0.0 }
  0x95   : > { %v270_v13 = vrot.slane %v269_v11, 4  ;;  %v277_v14 = vrot.slane %v276_v12, 4 }
  0x97   : > { %v271_v15 = vadd.f32 %v270_v13, %v269_v11  ;;  %v278_v16 = vadd.f32 %v277_v14, %v276_v12 }
  0x99   : > { %v272_v17 = vrot.slane %v271_v15, 2  ;;  %v279_v18 = vrot.slane %v278_v16, 2 }
  0x9b   : > { %v273_v19 = vadd.f32 %v272_v17, %v271_v15  ;;  %v280_v20 = vadd.f32 %v279_v18, %v278_v16  ;;  %v695_v17 = vld [vmem:[%s1046_s3 + $0x8] sm:$0xff] }
  0x9d   : > { %v274_v21 = vrot.slane %v273_v19, 1  ;;  %v281_v22 = vrot.slane %v280_v20, 1 }
  0x9f   : > { %v275_v23 = vadd.f32 %v274_v21, %v273_v19  ;;  %v282_v24 = vadd.f32 %v281_v22, %v280_v20 }
  0xa1   : > { %v283_v25 = vmax.f32 %v275_v23, %v282_v24 }
  0xa3   : > { %284 = vmax.xlane.f32.xlu0 %v283_v25 }
 0x116   : > { %v285_v26 = vpop.xlane.xlu0 %284 }
 0x117   : > { %v286_v27 = vsub.f32 %v275_v23, %v285_v26  ;;  %v287_v28 = vsub.f32 %v282_v24, %v285_v26 }
 0x119   : > { %v288_v29 = vmul.f32 1.442695, %v286_v27  ;;  %v290_v30 = vmul.f32 1.442695, %v287_v28 }
 0x11b   : > { %770 = vpow2.f32 %v288_v29 }
 0x11c   : > { %772 = vpow2.f32 %v290_v30 }
 0x121   : > { %v771_v31 = vpop.eup %770 }
 0x122   : > { %v773_v32 = vpop.eup %772 }
 0x123   : > { %v311_v33 = vrot.slane %v773_v32, 4  ;;  %v292_v34 = vadd.f32 %v773_v32, %v771_v31 }
 0x125   : > { %v312_v35 = vsel %vm268_vm0, %v771_v31, %v311_v33  ;;  %293 = vadd.xlane.f32.xlu1 %v292_v34 }
 0x126   : > { %v314_v36 = vmul.f32 %v312_v35, %v948_v6 }
 0x128   : > { %316 = vst [vmem:[#allocation1] ss:$2 sm:$0xff] %v314_v36 }
 0x12f   : > { %v317_v37 = vld.sshfl [vmem:[#allocation1] sm:$0xff pattern:$0x75316420]  ;;  %v318_v38 = vld.sshfl [vmem:[#allocation1 + $0x8] sm:$0xff pattern:$0x75316420] }
 0x130   : > { %v321_v39 = vsel %vm268_vm0, %v317_v37, 0.0  ;;  %v322_v40 = vsel %vm268_vm0, %v318_v38, 0.0 }
 0x131   : > { %v323_v41 = vadd.f32 %v322_v40, %v321_v39 }
 0x133   : > { %324 = vadd.xlane.f32.xlu1 %v323_v41 }
 0x198   : > { %v294_v42 = vpop.xlane.xlu1 %293 }
 0x199   : > { %774 = vrcp.f32 %v294_v42  ;;  %v306_v46 = vand.u32 2147483648, %v294_v42  ;;  %v304_v48 = vand.u32 2147483647, %v294_v42  ;;  %vm300_vm2 = vweird.f32 %v294_v42 }
 0x19a   : > { %776 = vrcp.f32 %v852_v61 }
 0x19b   : > { %v307_v50 = vor.u32 1.1754944e-38, %v306_v46  ;;  %vm305_vm4 = vcmp.eq.f32.partialorder %v304_v48, 8.507059e+37 }
 0x19f   : > { %v775_v43 = vpop.eup %774 }
 0x1a0   : > { %v296_v44 = vmul.f32 %v775_v43, %v294_v42  ;;  %vm301_vm1 = vweird.f32 %v775_v43  ;;  %v777_v62 = vpop.eup %776 }
 0x1a1   : > { %vm302_vm3 = vmor %vm300_vm2, %vm301_vm1  ;;  %v368_v63 = vmul.f32 8.0, %v777_v62  ;;  %vm372_vm7 = vweird.f32 %v777_v62 }
 0x1a2   : > { %v297_v45 = vsub.f32 1.0, %v296_v44 }
 0x1a3   : > { %v369_v0 = vsub.f32 1.0, %v368_v63 }
 0x1a4   : > { %v298_v47 = vmul.f32 %v775_v43, %v297_v45 }
 0x1a5   : > { %v370_v5 = vmul.f32 %v777_v62, %v369_v0 }
 0x1a6   : > { %v299_v49 = vadd.f32 %v775_v43, %v298_v47  ;;  %v325_v53 = vpop.xlane.xlu1 %324 }
 0x1a7   : > { %v371_v9 = vadd.f32 %v777_v62, %v370_v5 }
 0x1a8   : > { %v303_v51 = vsel %vm302_vm3, %v775_v43, %v299_v49 }
 0x1a9   : > { %v308_v52 = vsel %vm305_vm4, %v307_v50, %v303_v51  ;;  %v373_v12 = vsel %vm372_vm7, %v777_v62, %v371_v9  ;;  %v423_v9 = vld [vmem:[%s1047_s4] sm:$0xf] }
 0x1aa   : > { %v326_v54 = vmul.f32 %v325_v53, %v308_v52 }
 0x1ac   : > { %692 = vmatpush.msk.msra.mxu0 %vm268_vm0, %v326_v54  ;;  %697 = vmatpush.msk.msra.mxu2 %vm268_vm0, %v326_v54 }
 0x1ad   : > { %693 = vmatmul.msk.f32.vlgmr.msra.gmra.mxu0 %vm329_vm5, %v328_v55  ;;  %698 = vmatmul.msk.f32.vlgmr.msra.gmra.mxu2 %vm329_vm5, %v696_v60 }
 0x22a   : > { %v353_v57 = vpop.f32.mrf.mxu0 }
 0x22b   : > { %v354_v58 = vadd.f32 %v353_v57, %v966_v56 }
 0x22d   : > { %v357_v59 = vsel %vm356_vm6, %v354_v58, 0.0 }
 0x22e   : > { %358 = vadd.xlane.f32.xlu2 %v357_v59 }
 0x230   : > { %v473_v18 = vpop.f32.mrf.mxu2 }
 0x231   : > { %v474_v19 = vadd.f32 %v695_v17, %v473_v18 }
 0x233   : > { %v476_v20 = vsel %vm356_vm6, %v474_v19, 0.0 }
 0x234   : > { %477 = vadd.xlane.f32.xlu1 %v476_v20 }
 0x24d   : > { %533 = vrot.lane.b32.xlu1 %v695_v17, %s853_s12 }
 0x255   : > { %418 = vrot.lane.b32.xlu1 %v966_v56, %s854_s13 }
 0x2a1   : > { %v359_v1 = vpop.xlane.xlu2 %358 }
 0x2a2   : > { %v360_v2 = vrot.slane %v359_v1, 4 }
 0x2a4   : > { %v361_v3 = vadd.f32 %v360_v2, %v359_v1 }
 0x2a6   : > { %v362_v7 = vrot.slane %v361_v3, 2 }
 0x2a7   : > { %v478_v28 = vpop.xlane.xlu1 %477 }
 0x2a8   : > { %v363_v8 = vadd.f32 %v362_v7, %v361_v3  ;;  %v479_v29 = vrot.slane %v478_v28, 4 }
 0x2aa   : > { %v364_v10 = vrot.slane %v363_v8, 1  ;;  %v480_v31 = vadd.f32 %v479_v29, %v478_v28 }
 0x2ac   : > { %v365_v11 = vadd.f32 %v364_v10, %v363_v8  ;;  %v481_v32 = vrot.slane %v480_v31, 2 }
 0x2ae   : > { %710 = vpush %v365_v11  ;;  %v482_v36 = vadd.f32 %v481_v32, %v480_v31 }
 0x2af   : > { %712 = vpush %v373_v12 }
 0x2b0   : > { %v483_v39 = vrot.slane %v482_v36, 1 }
 0x2b2   : > { %v484_v42 = vadd.f32 %v483_v39, %v482_v36 }
 0x2bf   : > { %v534_v51 = vpop.permute.xlu1 %533 }
 0x2c7   : > { %v419_v60 = vpop.permute.xlu1 %418 }
 0x2df   : > { %s711_s28 = spop %710 }
 0x2e0   : > { %s973_s29 = spop %712 }
 0x2e1   : > { %s375_s9 = smul.f32 %s973_s29, %s711_s28 }
 0x2e3   : > { %v376_v13 = vstv %s375_s9 }
 0x2e4   : > { %v976_v14 = vsub.f32 %v354_v58, %v376_v13 }
 0x2e6   : > { %v378_v15 = vmul.f32 %v976_v14, %v976_v14 }
 0x2e8   : > { %v379_v16 = vsel %vm356_vm6, %v378_v15, 0.0  ;;  %v699_v15 = vld [vmem:[%s1047_s4 + $0x4] sm:$0xf] }
 0x2e9   : > { %380 = vadd.xlane.f32.xlu2 %v379_v16  ;;  %v700_v16 = vld [vmem:[%s1048_s5 + $0x4] sm:$0xf] }
 0x35c   : > { %v381_v21 = vpop.xlane.xlu2 %380 }
 0x35d   : > { %v382_v22 = vrot.slane %v381_v21, 4 }
 0x35f   : > { %v383_v23 = vadd.f32 %v382_v22, %v381_v21 }
 0x361   : > { %v384_v24 = vrot.slane %v383_v23, 2 }
 0x363   : > { %v385_v25 = vadd.f32 %v384_v24, %v383_v23 }
 0x365   : > { %v386_v26 = vrot.slane %v385_v25, 1 }
 0x367   : > { %v387_v27 = vadd.f32 %v386_v26, %v385_v25 }
 0x369   : > { %714 = vpush %v387_v27 }
 0x39a   : > { %s715_s14 = spop %714 }
 0x39b   : > { %s397_s15 = smul.f32 %s715_s14, %s973_s29 }
 0x39d   : > { %s398_s16 = sadd.f32 1e-05, %s397_s15  ;;  %s806_s15 = scalar_lea.hbm %s1049_s6, 16 }
 0x39f   : > { %v399_v30 = vstv %s398_s16 }
 0x3a0   : > { %778 = vrsqrt.f32 %v399_v30  ;;  %vm406_vm9 = vweird.f32 %v399_v30 }
 0x3a6   : > { %v779_v33 = vpop.eup %778 }
 0x3a7   : > { %v401_v34 = vmul.f32 %v779_v33, %v399_v30  ;;  %vm407_vm8 = vweird.f32 %v779_v33 }
 0x3a8   : > { %vm408_vm10 = vmor %vm406_vm9, %vm407_vm8 }
 0x3a9   : > { %v402_v35 = vmul.f32 %v779_v33, %v401_v34 }
 0x3ab   : > { %v403_v37 = vmul.f32 0.5, %v402_v35 }
 0x3ad   : > { %v404_v38 = vsub.f32 1.5, %v403_v37 }
 0x3af   : > { %v405_v40 = vmul.f32 %v779_v33, %v404_v38 }
 0x3b1   : > { %v409_v41 = vsel %vm408_vm10, %v779_v33, %v405_v40 }
 0x3b2   : > { %716 = vpush %v409_v41 }
 0x3b3   : > { %718 = vpush %v484_v42 }
 0x3e3   : > { %s717_s17 = spop %716 }
 0x3e4   : > { %s719_s18 = spop %718  ;;  %v411_v57 = vstv %s717_s17  ;;  %s242_s17 = sand.u32 1, %s840_s22  }
 0x3e5   : > { %s494_s19 = smul.f32 %s719_s18, %s973_s29  ;;  %v412_v58 = vmul.f32 %v411_v57, %v976_v14  ;;  %s689_s18 = sshll.u32 %s242_s17, 3 }
 0x3e6   : > { %s244_s9 = scalar_lea.vmem [#allocation2], %s689_s18 }
 0x3e7   : > { %v495_v43 = vstv %s494_s19  ;;  %s709_s19 = sshll.u32 %s911_s25, 3  ;;  %s623_s10 = sshll.u32 %s244_s9, 4  ;;  %s624_s10 = int_to_ptr.vmem [resolvable:$true] %s623_s10 }
 0x3e8   : > { %v496_v44 = vsub.f32 %v474_v19, %v495_v43  ;;  %s610_s25 = scalar_lea.sflag [#allocation3], %s242_s17 }
 0x3ea   : > { %v497_v45 = vmul.f32 %v496_v44, %v496_v44 }
 0x3ec   : > { %v498_v46 = vsel %vm356_vm6, %v497_v45, 0.0 }
 0x3ed   : > { %499 = vadd.xlane.f32.xlu2 %v498_v46 }
 0x405   : > { %537 = vrot.lane.b32.xlu2 %v695_v17, %s854_s13  ;;  %v424_v17 = vld [vmem:[%s1048_s5] sm:$0xf] }
 0x40d   : > { %414 = vrot.lane.b32.xlu2 %v966_v56, %s853_s12 }
 0x460   : > { %v500_v47 = vpop.xlane.xlu2 %499 }
 0x461   : > { %v501_v48 = vrot.slane %v500_v47, 4 }
 0x463   : > { %v502_v49 = vadd.f32 %v501_v48, %v500_v47 }
 0x465   : > { %v503_v50 = vrot.slane %v502_v49, 2 }
 0x467   : > { %v504_v52 = vadd.f32 %v503_v50, %v502_v49 }
 0x468   : > { %v538_v53 = vpop.permute.xlu2 %537 }
 0x469   : > { %v505_v54 = vrot.slane %v504_v52, 1 }
 0x46b   : > { %v506_v55 = vadd.f32 %v505_v54, %v504_v52 }
 0x46d   : > { %720 = vpush %v506_v55 }
 0x470   : > { %v415_v59 = vpop.permute.xlu2 %414 }
 0x471   : > { %v417_v61 = vmul.f32 %v415_v59, %v412_v58 }
 0x473   : > { %v421_v62 = vadd.f32 %v419_v60, %v417_v61 }
 0x475   : > { %v422_v63 = vmax.f32 %v421_v62, 0.0 }
 0x477   : > { %444 = vmatpush.msra.mxu1 %v422_v63 }
 0x478   : > { %694 = vmatmul.msk.f32.vlgmr.msra.gmra.mxu1 %vm425_vm14, %v423_v9 }
 0x49e   : > { %s721_s20 = spop %720 }
 0x49f   : > { %s516_s26 = smul.f32 %s721_s20, %s973_s29 }
 0x4a1   : > { %s517_s28 = sadd.f32 1e-05, %s516_s26 }
 0x4a3   : > { %v518_v56 = vstv %s517_s28  ;;  %s621_s28 = scalar_lea.hbm %s1049_s6, %s709_s19 }
 0x4a4   : > { %780 = vrsqrt.f32 %v518_v56  ;;  %vm525_vm12 = vweird.f32 %v518_v56 }
 0x4aa   : > { %v781_v0 = vpop.eup %780 }
 0x4ab   : > { %v520_v1 = vmul.f32 %v781_v0, %v518_v56  ;;  %vm526_vm11 = vweird.f32 %v781_v0 }
 0x4ac   : > { %vm527_vm13 = vmor %vm525_vm12, %vm526_vm11 }
 0x4ad   : > { %v521_v2 = vmul.f32 %v781_v0, %v520_v1 }
 0x4af   : > { %v522_v3 = vmul.f32 0.5, %v521_v2 }
 0x4b1   : > { %v523_v5 = vsub.f32 1.5, %v522_v3 }
 0x4b3   : > { %v524_v7 = vmul.f32 %v781_v0, %v523_v5 }
 0x4b5   : > { %v528_v8 = vsel %vm527_vm13, %v781_v0, %v524_v7 }
 0x4b6   : > { %722 = vpush %v528_v8 }
 0x4e7   : > { %s723_s29 = spop %722 }
 0x4e8   : > { %v530_v10 = vstv %s723_s29  ;;  %s625_s29 = sshll.u32 %s621_s28, 4  ;;  %s626_s29 = int_to_ptr.hbm [resolvable:$true] %s625_s29 }
 0x4e9   : > { %v531_v11 = vmul.f32 %v530_v10, %v496_v44  ;;  %s800_s11 = sshra.s32 %s626_s29, 4  ;;  %s801_s11 = int_to_ptr.hbm [resolvable:$true] %s800_s11 }
 0x4ea   : > { %s802_s12 = scalar_lea.hbm %s801_s11, 8  ;;  %p807_p0 = scmp.lt.s32.totalorder %s801_s11, %s1049_s6 }
 0x4eb   : > { %v536_v12 = vmul.f32 %v534_v51, %v531_v11  ;;  %p803_p11 = scmp.ne.s32.totalorder %s801_s11, %s802_s12  ;;  %p808_p1 = scmp.lt.s32.totalorder %s806_s15, %s802_s12 }
 0x4ed   : > { %v540_v13 = vadd.f32 %v538_v53, %v536_v12  ;;  %p804_p12 = pnand %p803_p11, %p928_p5  ;;  %p809_p2 = por %p808_p1, %p807_p0 }
 0x4ef   : > { %v541_v14 = vmax.f32 %v540_v13, 0.0  ;;  %p805_p13 = pneg %p804_p12 }
 0x4f1   : > { %564 = vmatpush.msra.mxu3 %v541_v14  ;;  %p810_p3 = pnand %p809_p2, %p805_p13 }
 0x4f2   : > { %701 = vmatmul.msk.f32.vlgmr.msra.gmra.mxu3 %vm425_vm14, %v699_v15 }
 0x4f5   : > { %v446_v18 = vpop.f32.mrf.mxu1 }
 0x4f6   : > { %v447_v20 = vadd.f32 %v446_v18, %v424_v17 }
 0x4f8   : > { %600 = vperm.xlu2 %769, %v447_v20  }
 0x552   : > { %v601_v35 = vpop.permute.xlu2 %600 }
 0x553   : > { %v605_v38 = vperm.slane %v601_v35, %v943_v4 }
 0x575   : > { %v566_v19 = vpop.f32.mrf.mxu3 }
 0x576   : > { %v567_v21 = vadd.f32 %v700_v16, %v566_v19 }
 0x578   : > { %v702_v22 = vmul.f32 -1.442695, %v567_v21 }
 0x57a   : > { %782 = vpow2.f32 %v702_v22 }
 0x580   : > { %v783_v23 = vpop.eup %782 }
 0x581   : > { %v572_v24 = vadd.f32 1.0, %v783_v23 }
 0x583   : > { %784 = vrcp.f32 %v572_v24  ;;  %v584_v28 = vand.u32 2147483648, %v572_v24  ;;  %v582_v30 = vand.u32 2147483647, %v572_v24  ;;  %vm578_vm0 = vweird.f32 %v572_v24 }
 0x585   : > { %v585_v32 = vor.u32 1.1754944e-38, %v584_v28  ;;  %vm583_vm2 = vcmp.eq.f32.partialorder %v582_v30, 8.507059e+37 }
 0x589   : > { %v785_v25 = vpop.eup %784 }
 0x58a   : > { %v574_v26 = vmul.f32 %v785_v25, %v572_v24  ;;  %vm579_vm15 = vweird.f32 %v785_v25 }
 0x58b   : > { %vm580_vm1 = vmor %vm578_vm0, %vm579_vm15 }
 0x58c   : > { %v575_v27 = vsub.f32 1.0, %v574_v26 }
 0x58e   : > { %v576_v29 = vmul.f32 %v785_v25, %v575_v27 }
 0x590   : > { %v577_v31 = vadd.f32 %v785_v25, %v576_v29 }
 0x592   : > { %v581_v33 = vsel %vm580_vm1, %v785_v25, %v577_v31 }
 0x593   : > { %v586_v34 = vsel %vm583_vm2, %v585_v32, %v581_v33 }
 0x594   : > { %590 = vperm.xlu0 %768, %v586_v34  }
 0x606   : > { %v591_v36 = vpop.permute.xlu0 %590 }
 0x607   : > { %v595_v37 = vperm.slane %v591_v36, %v943_v4 }
 0x609   : > { %v597_v39 = vmul.f32 %v595_v37, %v948_v6 }
 0x60b   : > { %v607_v40 = vadd.f32 %v605_v38, %v597_v39 }
 0x60d   : > { %608 = vst [vmem:[%s244_s9] sm:$0xff] %v607_v40 }
 0x60e   : > { %813 = shalt.err (!%p810_p3)
}
 0x60f   : > { %724 = dma.vmem_to_hbm [thread:$0]  (%p928_p5), %s624_s10, 128, %s626_s29, %s610_s25  }
 0x610 PF: > { %p730_p4 = scmp.ge.s32.totalorder %s848_s24, 2  ;;  %s637_s17 = sand.u32 1, %s836_s21  }
 0x611   : > { %s638_s19 = scalar_lea.sflag [#allocation3], %s637_s17 }
 0x612   : > { %p727_p7 = pnand %p730_p4, %p932_p6 }
 0x614   : > { %p728_p8 = pneg %p727_p7 }
 0x616   : > { %831 = dma.done.wait (%p728_p8), %s638_s19, 128  }
 0x617   : > { %833 = vsyncadd (%p728_p8), %s638_s19, 4294967168  ;;  %p16_p9 = scmp.ge.s32.totalorder %s915_s27, 4   ;;  %s1052_s21 = smov %s840_s22 }
 0x618   : > { %s1053_s22 = smov %s844_s23  ;;  %s1054_s23 = smov %s926_s30 }
 0x619   : > { %s1055_s24 = smov %s915_s27  ;;  %18 = sbr.rel (!%p16_p9) target bundleno = 3 (0x3), region = 83 }
 0x61e   :  { %644 = vsyncpa [#allocation3], 1 }
 0x61f   :  { %646 = vsyncpa [#allocation3 + $0x1], 1 }

</bundles_post_ra>
